<compile_context>
chip_gen: v6e
topology: v6e:2x2x1
jax: 0.10.0
libtpu: 0.0.40
codegen_flags: <defaults>
</compile_context>

<pallas_src>
import functools
import math

import jax
import jax.numpy as jnp
from jax.experimental import pallas as pl
from jax.experimental.pallas import tpu as pltpu

LANE = 128                 # hardware lane width
FEATURE_ALIGN = 128        # pad feature dims to the lane width only
BATCH_ALIGN = 16           # bf16 sublane pack (16, 128) -> keep batch tiles 16-aligned
VMEM_HEADROOM = 12 * 1024 * 1024   # leave room for compiler-internal scratch
NEG_BIG = -1e30            # finite "minus infinity" baked into padded output bias


def _round_up(n, m):
    return ((n + m - 1) // m) * m


def _vmem_capacity_bytes():
    """Physical VMEM of the current TPU generation (conservative default)."""
    try:
        info = pltpu.get_tpu_info()
        cap = getattr(info, "vmem_capacity_bytes", None)
        if cap:
            return int(cap)
    except Exception:
        pass
    return 64 * 1024 * 1024  # v7x per-TC value; safe lower bound everywhere


# ----------------------------------------------------------------------------
# Kernel
# ----------------------------------------------------------------------------
def _make_mlp_kernel(num_layers, activation, compute_dtype):
    """Kernel generic over the number of (W, b) layers.

    Ref order: (x_ref, w0, b0, w1, b1, ..., w{L-1}, b{L-1}, o_ref).
    """

    def act(h):
        if activation == "relu":
            return jnp.maximum(h, 0.0)
        elif activation == "sigmoid":
            return jax.nn.sigmoid(h)
        else:  # 'tanh'
            return jnp.tanh(h)

    def kernel(*refs):
        x_ref = refs[0]
        o_ref = refs[-1]
        wb = refs[1:-1]
        assert len(wb) == 2 * num_layers

        h = x_ref[...]                              # (TB, in_p) bf16
        logits = None
        for l in range(num_layers):
            w = wb[2 * l][...]                      # (d_in_p, d_out_p) bf16
            b = wb[2 * l + 1][...]                  # (1, d_out_p) f32
            z = jnp.dot(h, w, preferred_element_type=jnp.float32) + b
            if l < num_layers - 1:
                # elementwise math in f32 (VPU/EUP), back to bf16 for the MXU
                h = act(z).astype(compute_dtype)
            else:
                logits = z                          # f32

        # Padded output columns already carry a -1e30 bias (baked in by
        # pad_params) and zero weight columns, so no iota/where mask here.
        m = jnp.max(logits, axis=-1, keepdims=True)
        e = jnp.exp(logits - m)
        s = jnp.sum(e, axis=-1, keepdims=True)
        # reciprocal goes to the EUP slot instead of a VPU divide
        o_ref[...] = (e * pl.reciprocal(s, approx=True)).astype(o_ref.dtype)

    return kernel


# ----------------------------------------------------------------------------
# Host-side parameter preparation (do ONCE, reuse every forward)
# ----------------------------------------------------------------------------
def pad_params(params, compute_dtype=jnp.bfloat16, feature_align=FEATURE_ALIGN):
    """Pad + cast weights/biases once.

    params: list of (W_T [in, out] f32, b [out] f32).
    Returns (padded_params, dims_p) with W_T padded to [in_p, out_p] in
    `compute_dtype` and b padded to [1, out_p] in f32.  The LAST layer's
    padded bias entries are set to -1e30 so padded logits vanish under the
    softmax without any in-kernel masking.
    """
    dims = [params[0][0].shape[0]] + [w.shape[1] for (w, _) in params]
    dims_p = [_round_up(d, feature_align) for d in dims]
    num_layers = len(params)

    padded = []
    for i, (w, b) in enumerate(params):
        is_last = i == num_layers - 1
        wp = jnp.pad(
            w.astype(jnp.float32),
            ((0, dims_p[i] - w.shape[0]), (0, dims_p[i + 1] - w.shape[1])),
        ).astype(compute_dtype)
        fill = NEG_BIG if is_last else 0.0
        bp = jnp.pad(
            b.astype(jnp.float32),
            (0, dims_p[i + 1] - b.shape[0]),
            constant_values=fill,
        )[None, :]
        padded.append((wp, bp))
    return padded, dims_p


# ----------------------------------------------------------------------------
# Forward pass
# ----------------------------------------------------------------------------
def _resident_spec(shape, single_buffer):
    """BlockSpec for a VMEM-resident operand (constant (0,0) index map)."""
    if single_buffer and hasattr(pl, "Buffered"):
        try:
            # Weights never change across grid steps -> no double buffering.
            return pl.BlockSpec(shape, lambda i: (0, 0),
                                pipeline_mode=pl.Buffered(1))
        except TypeError:
            pass
    return pl.BlockSpec(shape, lambda i: (0, 0))


def _pick_batch_tile(B, max_tile):
    b_al = _round_up(max(B, 1), BATCH_ALIGN)
    TB = min(max_tile, b_al)
    # Give the parallel axis >= 2 grid steps (v7x: 2 TensorCores) whenever the
    # aligned batch is big enough but would otherwise fit in a single tile.
    if TB >= b_al and b_al >= 2 * BATCH_ALIGN:
        TB = _round_up(-(-b_al // 2), BATCH_ALIGN)
    return TB


@functools.partial(
    jax.jit,
    static_argnames=(
        "out_size", "activation", "compute_dtype", "out_dtype",
        "single_buffer_weights", "batch_tile",
    ),
)
def _ann_forward_jit(x, padded_params, *, out_size, activation, compute_dtype,
                     out_dtype, single_buffer_weights, batch_tile):
    B, in_size = x.shape
    num_layers = len(padded_params)
    in_p = padded_params[0][0].shape[0]
    out_p = padded_params[-1][0].shape[1]
    dims_p = [in_p] + [wp.shape[1] for (wp, _) in padded_params]
    max_dim_p = max(dims_p)

    act_isz = jnp.dtype(compute_dtype).itemsize
    out_isz = jnp.dtype(out_dtype).itemsize

    # --- generation-aware VMEM budget -------------------------------------
    vmem_cap = _vmem_capacity_bytes()
    budget_cap = max(vmem_cap - VMEM_HEADROOM, 16 * 1024 * 1024)

    weight_factor = 1 if single_buffer_weights else 2
    weight_bytes = weight_factor * sum(
        wp.size * wp.dtype.itemsize + bp.size * bp.dtype.itemsize
        for wp, bp in padded_params
    )
    # TODO(synk): if resident padded weights exceed ~half of VMEM (multi-K
    # hidden widths on v7x's 64 MiB), stream the large layers over their
    # feature dims (extra grid axis / pltpu.emit_pipeline) instead of keeping
    # every layer fully resident.

    if batch_tile is not None:
        max_tile = batch_tile
    else:
        # 128 MiB-VMEM parts (v5e/v6e): bigger tiles amortize per-step
        # overhead and MXU weight pushes; 64 MiB parts (v7x): stay smaller.
        max_tile = 512 if vmem_cap >= 100 * 1024 * 1024 else 256

    TB = _pick_batch_tile(B, max_tile)

    def footprint(tb):
        io = 2 * tb * (in_p * act_isz + out_p * out_isz)     # double-buffered x/out
        inter = (num_layers + 2) * tb * max_dim_p * 4         # f32 intermediates
        return weight_bytes + io + inter

    while footprint(TB) > budget_cap and TB > BATCH_ALIGN:
        TB = _round_up(TB // 2, BATCH_ALIGN)

    Bp = _round_up(_round_up(max(B, 1), BATCH_ALIGN), TB)

    vmem_limit = int(1.5 * footprint(TB))
    vmem_limit = min(max(vmem_limit, 16 * 1024 * 1024), budget_cap)

    # --- staging: cast BEFORE pad (halves host-side staging HBM traffic) ---
    xp = jnp.pad(x.astype(compute_dtype), ((0, Bp - B), (0, in_p - in_size)))

    # x / output index the batch axis; weights & biases stay VMEM-resident.
    in_specs = [pl.BlockSpec((TB, in_p), lambda i: (i, 0))]
    flat_inputs = [xp]
    for wp, bp in padded_params:
        flat_inputs += [wp, bp]
        in_specs += [
            _resident_spec(wp.shape, single_buffer_weights),
            _resident_spec(bp.shape, single_buffer_weights),
        ]
    out_spec = pl.BlockSpec((TB, out_p), lambda i: (i, 0))

    kernel = _make_mlp_kernel(num_layers, activation, compute_dtype)

    y_p = pl.pallas_call(
        kernel,
        out_shape=jax.ShapeDtypeStruct((Bp, out_p), out_dtype),
        grid=(Bp // TB,),
        in_specs=in_specs,
        out_specs=out_spec,
        compiler_params=pltpu.CompilerParams(
            dimension_semantics=("parallel",),
            vmem_limit_bytes=vmem_limit,
        ),
    )(*flat_inputs)

    # External contract stays f32 (PyTorch semantics); the kernel's HBM write
    # itself was bf16.
    return y_p[:B, :out_size].astype(jnp.float32)


_SINGLE_BUFFER_OK = None  # lazily probed: does this Pallas accept Buffered(1)?


def ann_forward_pallas(x, padded_params, out_size, activation="relu",
                       compute_dtype=jnp.bfloat16, out_dtype=jnp.bfloat16,
                       batch_tile=None):
    """x: [B, input_size] f32; padded_params: output of pad_params()."""
    global _SINGLE_BUFFER_OK
    padded_params = tuple(tuple(p) for p in padded_params)
    kwargs = dict(out_size=out_size, activation=activation,
                  compute_dtype=compute_dtype, out_dtype=out_dtype,
                  batch_tile=batch_tile)

    if _SINGLE_BUFFER_OK is not False:
        try:
            y = _ann_forward_jit(x, padded_params,
                                 single_buffer_weights=True, **kwargs)
            _SINGLE_BUFFER_OK = True
            return y
        except Exception:
            if _SINGLE_BUFFER_OK is True:
                raise
            _SINGLE_BUFFER_OK = False  # fall back to default double-buffering
    return _ann_forward_jit(x, padded_params,
                            single_buffer_weights=False, **kwargs)


# ----------------------------------------------------------------------------
# Params init + pure-JAX references
# ----------------------------------------------------------------------------
def init_params(key, input_size, hidden_dimensions, output_size):
    """PyTorch nn.Linear-style init (uniform +-1/sqrt(fan_in)); W stored as [in, out]."""
    dims = [input_size] + list(hidden_dimensions) + [output_size]
    params = []
    for i in range(len(dims) - 1):
        fan_in, fan_out = dims[i], dims[i + 1]
        key, kw, kb = jax.random.split(key, 3)
        bound = 1.0 / math.sqrt(fan_in)
        w_t = jax.random.uniform(kw, (fan_in, fan_out), jnp.float32, -bound, bound)
        b = jax.random.uniform(kb, (fan_out,), jnp.float32, -bound, bound)
        params.append((w_t, b))
    return params


def _act_fn(activation):
    return {
        "relu": lambda h: jnp.maximum(h, 0.0),
        "sigmoid": jax.nn.sigmoid,
        "tanh": jnp.tanh,
    }[activation]


def ann_forward_ref_f32(x, params, activation="relu"):
    """Full-f32 reference (matches PyTorch module semantics)."""
    act = _act_fn(activation)
    h = x
    for (w, b) in params[:-1]:
        h = act(h @ w + b)
    w, b = params[-1]
    return jax.nn.softmax(h @ w + b, axis=-1)


def ann_forward_ref_bf16(x, params, activation="relu"):
    """Reference using the same bf16-operand / f32-accumulate path as the kernel."""
    act = _act_fn(activation)
    h = x.astype(jnp.bfloat16)
    for (w, b) in params[:-1]:
        z = jnp.dot(h, w.astype(jnp.bfloat16), preferred_element_type=jnp.float32) + b
        h = act(z).astype(jnp.bfloat16)
    w, b = params[-1]
    logits = jnp.dot(h, w.astype(jnp.bfloat16), preferred_element_type=jnp.float32) + b
    return jax.nn.softmax(logits, axis=-1)


# ----------------------------------------------------------------------------
# Test
# ----------------------------------------------------------------------------
if __name__ == "__main__":
    key = jax.random.PRNGKey(0)

    # Config 1 matches ANN(input_size=8, output_size=4, 'relu', (4, 3, 4)).
    # Config 2 exercises the generic layer count (single hidden layer, tanh).
    configs = [
        dict(input_size=8, output_size=4, hidden=(4, 3, 4), activation="relu", batch=2),
        dict(input_size=6, output_size=3, hidden=(5,), activation="tanh", batch=5),
    ]

    for cfg in configs:
        key, kx, kp = jax.random.split(key, 3)
        x = jax.random.normal(kx, (cfg["batch"], cfg["input_size"]), jnp.float32)
        params = init_params(kp, cfg["input_size"], cfg["hidden"], cfg["output_size"])

        # Pad/cast weights once (cached outside the forward call).
        padded_params, _ = pad_params(params)

        y = ann_forward_pallas(
            x, padded_params, cfg["output_size"], cfg["activation"]
        )
        y = jax.block_until_ready(y)

        assert y.shape == (cfg["batch"], cfg["output_size"]), y.shape
        assert bool(jnp.all(jnp.isfinite(y)))

        # Check against a reference following the same bf16/f32 dtype path
        # (kernel additionally rounds the output through bf16).
        y_ref_bf16 = ann_forward_ref_bf16(x, params, cfg["activation"])
        assert jnp.allclose(y, y_ref_bf16, atol=1e-2, rtol=1e-2), (y, y_ref_bf16)

        # Loose check against the full-f32 (PyTorch-semantics) reference.
        y_ref_f32 = ann_forward_ref_f32(x, params, cfg["activation"])
        assert jnp.allclose(y, y_ref_f32, atol=3e-2, rtol=3e-2), (y, y_ref_f32)

        # Softmax rows sum to ~1 (approx reciprocal + bf16 output rounding).
        assert jnp.allclose(jnp.sum(y, axis=-1), 1.0, atol=2e-2)

    print("KERNEL_OK")
</pallas_src>

<mosaic_0001>
module attributes {stable_mosaic.version = 11 : i64} {
  func.func @kernel(%arg0: i32, %arg1: memref<16x128xbf16, #tpu.memory_space<vmem>>, %arg2: memref<128x128xbf16, #tpu.memory_space<vmem>>, %arg3: memref<1x128xf32, #tpu.memory_space<vmem>>, %arg4: memref<128x128xbf16, #tpu.memory_space<vmem>>, %arg5: memref<1x128xf32, #tpu.memory_space<vmem>>, %arg6: memref<128x128xbf16, #tpu.memory_space<vmem>>, %arg7: memref<1x128xf32, #tpu.memory_space<vmem>>, %arg8: memref<128x128xbf16, #tpu.memory_space<vmem>>, %arg9: memref<1x128xf32, #tpu.memory_space<vmem>>, %arg10: memref<16x128xbf16, #tpu.memory_space<vmem>>) attributes {dimension_semantics = [#tpu.dimension_semantics<parallel>], iteration_bounds = array<i64: 1>, scalar_prefetch = 0 : i64, scratch_operands = 0 : i64, tpu.core_type = #tpu.core_type<tc>, window_params = [{transform_indices = @transform_0, window_bounds = array<i64: 16, 128>}, {pipeline_mode = #tpu.pipeline_mode<synchronous>, transform_indices = @transform_1, window_bounds = array<i64: 128, 128>}, {pipeline_mode = #tpu.pipeline_mode<synchronous>, transform_indices = @transform_2, window_bounds = array<i64: 1, 128>}, {pipeline_mode = #tpu.pipeline_mode<synchronous>, transform_indices = @transform_3, window_bounds = array<i64: 128, 128>}, {pipeline_mode = #tpu.pipeline_mode<synchronous>, transform_indices = @transform_4, window_bounds = array<i64: 1, 128>}, {pipeline_mode = #tpu.pipeline_mode<synchronous>, transform_indices = @transform_5, window_bounds = array<i64: 128, 128>}, {pipeline_mode = #tpu.pipeline_mode<synchronous>, transform_indices = @transform_6, window_bounds = array<i64: 1, 128>}, {pipeline_mode = #tpu.pipeline_mode<synchronous>, transform_indices = @transform_7, window_bounds = array<i64: 128, 128>}, {pipeline_mode = #tpu.pipeline_mode<synchronous>, transform_indices = @transform_8, window_bounds = array<i64: 1, 128>}, {transform_indices = @transform_9, window_bounds = array<i64: 16, 128>}]} {
    %c0 = arith.constant 0 : index
    %c0_0 = arith.constant 0 : index
    %0 = vector.load %arg1[%c0, %c0_0] : memref<16x128xbf16, #tpu.memory_space<vmem>>, vector<16x128xbf16>
    %c0_1 = arith.constant 0 : index
    %c0_2 = arith.constant 0 : index
    %1 = vector.load %arg2[%c0_1, %c0_2] : memref<128x128xbf16, #tpu.memory_space<vmem>>, vector<128x128xbf16>
    %c0_3 = arith.constant 0 : index
    %c0_4 = arith.constant 0 : index
    %2 = vector.load %arg3[%c0_3, %c0_4] : memref<1x128xf32, #tpu.memory_space<vmem>>, vector<1x128xf32>
    %cst = arith.constant dense<0.000000e+00> : vector<16x128xf32>
    %3 = tpu.matmul %0, %1, %cst {dimension_numbers = #tpu.dot_dimension_numbers<[1], [0], [0], [1], [0, 0, 1, 1], [], []>} : vector<16x128xbf16>, vector<128x128xbf16>, vector<16x128xf32> -> vector<16x128xf32>
    %4 = vector.broadcast %2 : vector<1x128xf32> to vector<16x128xf32>
    %5 = arith.addf %3, %4 : vector<16x128xf32>
    %cst_5 = arith.constant 0.000000e+00 : f32
    %6 = vector.broadcast %cst_5 : f32 to vector<16x128xf32>
    %7 = arith.maximumf %5, %6 : vector<16x128xf32>
    %8 = arith.truncf %7 : vector<16x128xf32> to vector<16x128xbf16>
    %c0_6 = arith.constant 0 : index
    %c0_7 = arith.constant 0 : index
    %9 = vector.load %arg4[%c0_6, %c0_7] : memref<128x128xbf16, #tpu.memory_space<vmem>>, vector<128x128xbf16>
    %c0_8 = arith.constant 0 : index
    %c0_9 = arith.constant 0 : index
    %10 = vector.load %arg5[%c0_8, %c0_9] : memref<1x128xf32, #tpu.memory_space<vmem>>, vector<1x128xf32>
    %cst_10 = arith.constant dense<0.000000e+00> : vector<16x128xf32>
    %11 = tpu.matmul %8, %9, %cst_10 {dimension_numbers = #tpu.dot_dimension_numbers<[1], [0], [0], [1], [0, 0, 1, 1], [], []>} : vector<16x128xbf16>, vector<128x128xbf16>, vector<16x128xf32> -> vector<16x128xf32>
    %12 = vector.broadcast %10 : vector<1x128xf32> to vector<16x128xf32>
    %13 = arith.addf %11, %12 : vector<16x128xf32>
    %cst_11 = arith.constant 0.000000e+00 : f32
    %14 = vector.broadcast %cst_11 : f32 to vector<16x128xf32>
    %15 = arith.maximumf %13, %14 : vector<16x128xf32>
    %16 = arith.truncf %15 : vector<16x128xf32> to vector<16x128xbf16>
    %c0_12 = arith.constant 0 : index
    %c0_13 = arith.constant 0 : index
    %17 = vector.load %arg6[%c0_12, %c0_13] : memref<128x128xbf16, #tpu.memory_space<vmem>>, vector<128x128xbf16>
    %c0_14 = arith.constant 0 : index
    %c0_15 = arith.constant 0 : index
    %18 = vector.load %arg7[%c0_14, %c0_15] : memref<1x128xf32, #tpu.memory_space<vmem>>, vector<1x128xf32>
    %cst_16 = arith.constant dense<0.000000e+00> : vector<16x128xf32>
    %19 = tpu.matmul %16, %17, %cst_16 {dimension_numbers = #tpu.dot_dimension_numbers<[1], [0], [0], [1], [0, 0, 1, 1], [], []>} : vector<16x128xbf16>, vector<128x128xbf16>, vector<16x128xf32> -> vector<16x128xf32>
    %20 = vector.broadcast %18 : vector<1x128xf32> to vector<16x128xf32>
    %21 = arith.addf %19, %20 : vector<16x128xf32>
    %cst_17 = arith.constant 0.000000e+00 : f32
    %22 = vector.broadcast %cst_17 : f32 to vector<16x128xf32>
    %23 = arith.maximumf %21, %22 : vector<16x128xf32>
    %24 = arith.truncf %23 : vector<16x128xf32> to vector<16x128xbf16>
    %c0_18 = arith.constant 0 : index
    %c0_19 = arith.constant 0 : index
    %25 = vector.load %arg8[%c0_18, %c0_19] : memref<128x128xbf16, #tpu.memory_space<vmem>>, vector<128x128xbf16>
    %c0_20 = arith.constant 0 : index
    %c0_21 = arith.constant 0 : index
    %26 = vector.load %arg9[%c0_20, %c0_21] : memref<1x128xf32, #tpu.memory_space<vmem>>, vector<1x128xf32>
    %cst_22 = arith.constant dense<0.000000e+00> : vector<16x128xf32>
    %27 = tpu.matmul %24, %25, %cst_22 {dimension_numbers = #tpu.dot_dimension_numbers<[1], [0], [0], [1], [0, 0, 1, 1], [], []>} : vector<16x128xbf16>, vector<128x128xbf16>, vector<16x128xf32> -> vector<16x128xf32>
    %28 = vector.broadcast %26 : vector<1x128xf32> to vector<16x128xf32>
    %29 = arith.addf %27, %28 : vector<16x128xf32>
    %cst_23 = arith.constant dense<0xFF800000> : vector<16xf32>
    %30 = vector.multi_reduction <maximumf>, %29, %cst_23 [1] : vector<16x128xf32> to vector<16xf32>
    %31 = vector.shape_cast %30 : vector<16xf32> to vector<16x1xf32>
    %32 = vector.broadcast %31 : vector<16x1xf32> to vector<16x128xf32>
    %33 = arith.subf %29, %32 : vector<16x128xf32>
    %34 = math.exp %33 : vector<16x128xf32>
    %cst_24 = arith.constant dense<0.000000e+00> : vector<16xf32>
    %35 = vector.multi_reduction <add>, %34, %cst_24 [1] : vector<16x128xf32> to vector<16xf32>
    %36 = vector.shape_cast %35 : vector<16xf32> to vector<16x1xf32>
    %37 = tpu.reciprocal %36 {approx = true} : vector<16x1xf32> -> vector<16x1xf32>
    %38 = vector.broadcast %37 : vector<16x1xf32> to vector<16x128xf32>
    %39 = arith.mulf %34, %38 : vector<16x128xf32>
    %40 = arith.truncf %39 : vector<16x128xf32> to vector<16x128xbf16>
    %c0_25 = arith.constant 0 : index
    %c0_26 = arith.constant 0 : index
    %41 = vector.load %arg10[%c0_25, %c0_26] : memref<16x128xbf16, #tpu.memory_space<vmem>>, vector<16x128xbf16>
    tpu.vector_store %arg10[%c0_25, %c0_26], %40 {strides = array<i32>} : memref<16x128xbf16, #tpu.memory_space<vmem>>, vector<16x128xbf16>,
    return
  }
  func.func @transform_0(%arg0: i32) -> (i32, i32) {
    %c0_i32 = arith.constant 0 : i32
    %c0_i32_0 = arith.constant 0 : i32
    return %arg0, %c0_i32 : i32, i32
  }
  func.func @transform_1(%arg0: i32) -> (i32, i32) {
    %c0_i32 = arith.constant 0 : i32
    %c0_i32_0 = arith.constant 0 : i32
    %c0_i32_1 = arith.constant 0 : i32
    return %c0_i32, %c0_i32_0 : i32, i32
  }
  func.func @transform_2(%arg0: i32) -> (i32, i32) {
    %c0_i32 = arith.constant 0 : i32
    %c0_i32_0 = arith.constant 0 : i32
    %c0_i32_1 = arith.constant 0 : i32
    return %c0_i32, %c0_i32_0 : i32, i32
  }
  func.func @transform_3(%arg0: i32) -> (i32, i32) {
    %c0_i32 = arith.constant 0 : i32
    %c0_i32_0 = arith.constant 0 : i32
    %c0_i32_1 = arith.constant 0 : i32
    return %c0_i32, %c0_i32_0 : i32, i32
  }
  func.func @transform_4(%arg0: i32) -> (i32, i32) {
    %c0_i32 = arith.constant 0 : i32
    %c0_i32_0 = arith.constant 0 : i32
    %c0_i32_1 = arith.constant 0 : i32
    return %c0_i32, %c0_i32_0 : i32, i32
  }
  func.func @transform_5(%arg0: i32) -> (i32, i32) {
    %c0_i32 = arith.constant 0 : i32
    %c0_i32_0 = arith.constant 0 : i32
    %c0_i32_1 = arith.constant 0 : i32
    return %c0_i32, %c0_i32_0 : i32, i32
  }
  func.func @transform_6(%arg0: i32) -> (i32, i32) {
    %c0_i32 = arith.constant 0 : i32
    %c0_i32_0 = arith.constant 0 : i32
    %c0_i32_1 = arith.constant 0 : i32
    return %c0_i32, %c0_i32_0 : i32, i32
  }
  func.func @transform_7(%arg0: i32) -> (i32, i32) {
    %c0_i32 = arith.constant 0 : i32
    %c0_i32_0 = arith.constant 0 : i32
    %c0_i32_1 = arith.constant 0 : i32
    return %c0_i32, %c0_i32_0 : i32, i32
  }
  func.func @transform_8(%arg0: i32) -> (i32, i32) {
    %c0_i32 = arith.constant 0 : i32
    %c0_i32_0 = arith.constant 0 : i32
    %c0_i32_1 = arith.constant 0 : i32
    return %c0_i32, %c0_i32_0 : i32, i32
  }
  func.func @transform_9(%arg0: i32) -> (i32, i32) {
    %c0_i32 = arith.constant 0 : i32
    %c0_i32_0 = arith.constant 0 : i32
    return %arg0, %c0_i32 : i32, i32
  }
}

module attributes {stable_mosaic.version = 11 : i64} {
  func.func @kernel(%arg0: i32, %arg1: memref<16x128xbf16, #tpu.memory_space<vmem>>, %arg2: memref<128x128xbf16, #tpu.memory_space<vmem>>, %arg3: memref<1x128xf32, #tpu.memory_space<vmem>>, %arg4: memref<128x128xbf16, #tpu.memory_space<vmem>>, %arg5: memref<1x128xf32, #tpu.memory_space<vmem>>, %arg6: memref<128x128xbf16, #tpu.memory_space<vmem>>, %arg7: memref<1x128xf32, #tpu.memory_space<vmem>>, %arg8: memref<128x128xbf16, #tpu.memory_space<vmem>>, %arg9: memref<1x128xf32, #tpu.memory_space<vmem>>, %arg10: memref<16x128xbf16, #tpu.memory_space<vmem>>) attributes {dimension_semantics = [#tpu.dimension_semantics<parallel>], iteration_bounds = array<i64: 1>, scalar_prefetch = 0 : i64, scratch_operands = 0 : i64, tpu.core_type = #tpu.core_type<tc>, window_params = [{transform_indices = @transform_0, window_bounds = array<i64: 16, 128>}, {pipeline_mode = #tpu.pipeline_mode<synchronous>, transform_indices = @transform_1, window_bounds = array<i64: 128, 128>}, {pipeline_mode = #tpu.pipeline_mode<synchronous>, transform_indices = @transform_2, window_bounds = array<i64: 1, 128>}, {pipeline_mode = #tpu.pipeline_mode<synchronous>, transform_indices = @transform_3, window_bounds = array<i64: 128, 128>}, {pipeline_mode = #tpu.pipeline_mode<synchronous>, transform_indices = @transform_4, window_bounds = array<i64: 1, 128>}, {pipeline_mode = #tpu.pipeline_mode<synchronous>, transform_indices = @transform_5, window_bounds = array<i64: 128, 128>}, {pipeline_mode = #tpu.pipeline_mode<synchronous>, transform_indices = @transform_6, window_bounds = array<i64: 1, 128>}, {pipeline_mode = #tpu.pipeline_mode<synchronous>, transform_indices = @transform_7, window_bounds = array<i64: 128, 128>}, {pipeline_mode = #tpu.pipeline_mode<synchronous>, transform_indices = @transform_8, window_bounds = array<i64: 1, 128>}, {transform_indices = @transform_9, window_bounds = array<i64: 16, 128>}]} {
    %c0 = arith.constant 0 : index
    %c0_0 = arith.constant 0 : index
    %0 = vector.load %arg1[%c0, %c0_0] : memref<16x128xbf16, #tpu.memory_space<vmem>>, vector<16x128xbf16>
    %c0_1 = arith.constant 0 : index
    %c0_2 = arith.constant 0 : index
    %1 = vector.load %arg2[%c0_1, %c0_2] : memref<128x128xbf16, #tpu.memory_space<vmem>>, vector<128x128xbf16>
    %c0_3 = arith.constant 0 : index
    %c0_4 = arith.constant 0 : index
    %2 = vector.load %arg3[%c0_3, %c0_4] : memref<1x128xf32, #tpu.memory_space<vmem>>, vector<1x128xf32>
    %cst = arith.constant dense<0.000000e+00> : vector<16x128xf32>
    %3 = tpu.matmul %0, %1, %cst {dimension_numbers = #tpu.dot_dimension_numbers<[1], [0], [0], [1], [0, 0, 1, 1], [], []>} : vector<16x128xbf16>, vector<128x128xbf16>, vector<16x128xf32> -> vector<16x128xf32>
    %4 = vector.broadcast %2 : vector<1x128xf32> to vector<16x128xf32>
    %5 = arith.addf %3, %4 : vector<16x128xf32>
    %cst_5 = arith.constant 0.000000e+00 : f32
    %6 = vector.broadcast %cst_5 : f32 to vector<16x128xf32>
    %7 = arith.maximumf %5, %6 : vector<16x128xf32>
    %8 = arith.truncf %7 : vector<16x128xf32> to vector<16x128xbf16>
    %c0_6 = arith.constant 0 : index
    %c0_7 = arith.constant 0 : index
    %9 = vector.load %arg4[%c0_6, %c0_7] : memref<128x128xbf16, #tpu.memory_space<vmem>>, vector<128x128xbf16>
    %c0_8 = arith.constant 0 : index
    %c0_9 = arith.constant 0 : index
    %10 = vector.load %arg5[%c0_8, %c0_9] : memref<1x128xf32, #tpu.memory_space<vmem>>, vector<1x128xf32>
    %cst_10 = arith.constant dense<0.000000e+00> : vector<16x128xf32>
    %11 = tpu.matmul %8, %9, %cst_10 {dimension_numbers = #tpu.dot_dimension_numbers<[1], [0], [0], [1], [0, 0, 1, 1], [], []>} : vector<16x128xbf16>, vector<128x128xbf16>, vector<16x128xf32> -> vector<16x128xf32>
    %12 = vector.broadcast %10 : vector<1x128xf32> to vector<16x128xf32>
    %13 = arith.addf %11, %12 : vector<16x128xf32>
    %cst_11 = arith.constant 0.000000e+00 : f32
    %14 = vector.broadcast %cst_11 : f32 to vector<16x128xf32>
    %15 = arith.maximumf %13, %14 : vector<16x128xf32>
    %16 = arith.truncf %15 : vector<16x128xf32> to vector<16x128xbf16>
    %c0_12 = arith.constant 0 : index
    %c0_13 = arith.constant 0 : index
    %17 = vector.load %arg6[%c0_12, %c0_13] : memref<128x128xbf16, #tpu.memory_space<vmem>>, vector<128x128xbf16>
    %c0_14 = arith.constant 0 : index
    %c0_15 = arith.constant 0 : index
    %18 = vector.load %arg7[%c0_14, %c0_15] : memref<1x128xf32, #tpu.memory_space<vmem>>, vector<1x128xf32>
    %cst_16 = arith.constant dense<0.000000e+00> : vector<16x128xf32>
    %19 = tpu.matmul %16, %17, %cst_16 {dimension_numbers = #tpu.dot_dimension_numbers<[1], [0], [0], [1], [0, 0, 1, 1], [], []>} : vector<16x128xbf16>, vector<128x128xbf16>, vector<16x128xf32> -> vector<16x128xf32>
    %20 = vector.broadcast %18 : vector<1x128xf32> to vector<16x128xf32>
    %21 = arith.addf %19, %20 : vector<16x128xf32>
    %cst_17 = arith.constant 0.000000e+00 : f32
    %22 = vector.broadcast %cst_17 : f32 to vector<16x128xf32>
    %23 = arith.maximumf %21, %22 : vector<16x128xf32>
    %24 = arith.truncf %23 : vector<16x128xf32> to vector<16x128xbf16>
    %c0_18 = arith.constant 0 : index
    %c0_19 = arith.constant 0 : index
    %25 = vector.load %arg8[%c0_18, %c0_19] : memref<128x128xbf16, #tpu.memory_space<vmem>>, vector<128x128xbf16>
    %c0_20 = arith.constant 0 : index
    %c0_21 = arith.constant 0 : index
    %26 = vector.load %arg9[%c0_20, %c0_21] : memref<1x128xf32, #tpu.memory_space<vmem>>, vector<1x128xf32>
    %cst_22 = arith.constant dense<0.000000e+00> : vector<16x128xf32>
    %27 = tpu.matmul %24, %25, %cst_22 {dimension_numbers = #tpu.dot_dimension_numbers<[1], [0], [0], [1], [0, 0, 1, 1], [], []>} : vector<16x128xbf16>, vector<128x128xbf16>, vector<16x128xf32> -> vector<16x128xf32>
    %28 = vector.broadcast %26 : vector<1x128xf32> to vector<16x128xf32>
    %29 = arith.addf %27, %28 : vector<16x128xf32>
    %cst_23 = arith.constant dense<0xFF800000> : vector<16xf32>
    %30 = vector.multi_reduction <maximumf>, %29, %cst_23 [1] : vector<16x128xf32> to vector<16xf32>
    %31 = vector.shape_cast %30 : vector<16xf32> to vector<16x1xf32>
    %32 = vector.broadcast %31 : vector<16x1xf32> to vector<16x128xf32>
    %33 = arith.subf %29, %32 : vector<16x128xf32>
    %34 = math.exp %33 : vector<16x128xf32>
    %cst_24 = arith.constant dense<0.000000e+00> : vector<16xf32>
    %35 = vector.multi_reduction <add>, %34, %cst_24 [1] : vector<16x128xf32> to vector<16xf32>
    %36 = vector.shape_cast %35 : vector<16xf32> to vector<16x1xf32>
    %37 = tpu.reciprocal %36 {approx = true} : vector<16x1xf32> -> vector<16x1xf32>
    %38 = vector.broadcast %37 : vector<16x1xf32> to vector<16x128xf32>
    %39 = arith.mulf %34, %38 : vector<16x128xf32>
    %40 = arith.truncf %39 : vector<16x128xf32> to vector<16x128xbf16>
    %c0_25 = arith.constant 0 : index
    %c0_26 = arith.constant 0 : index
    %41 = vector.load %arg10[%c0_25, %c0_26] : memref<16x128xbf16, #tpu.memory_space<vmem>>, vector<16x128xbf16>
    tpu.vector_store %arg10[%c0_25, %c0_26], %40 {strides = array<i32>} : memref<16x128xbf16, #tpu.memory_space<vmem>>, vector<16x128xbf16>,
    return
  }
  func.func @transform_0(%arg0: i32) -> (i32, i32) {
    %c0_i32 = arith.constant 0 : i32
    %c0_i32_0 = arith.constant 0 : i32
    return %arg0, %c0_i32 : i32, i32
  }
  func.func @transform_1(%arg0: i32) -> (i32, i32) {
    %c0_i32 = arith.constant 0 : i32
    %c0_i32_0 = arith.constant 0 : i32
    %c0_i32_1 = arith.constant 0 : i32
    return %c0_i32, %c0_i32_0 : i32, i32
  }
  func.func @transform_2(%arg0: i32) -> (i32, i32) {
    %c0_i32 = arith.constant 0 : i32
    %c0_i32_0 = arith.constant 0 : i32
    %c0_i32_1 = arith.constant 0 : i32
    return %c0_i32, %c0_i32_0 : i32, i32
  }
  func.func @transform_3(%arg0: i32) -> (i32, i32) {
    %c0_i32 = arith.constant 0 : i32
    %c0_i32_0 = arith.constant 0 : i32
    %c0_i32_1 = arith.constant 0 : i32
    return %c0_i32, %c0_i32_0 : i32, i32
  }
  func.func @transform_4(%arg0: i32) -> (i32, i32) {
    %c0_i32 = arith.constant 0 : i32
    %c0_i32_0 = arith.constant 0 : i32
    %c0_i32_1 = arith.constant 0 : i32
    return %c0_i32, %c0_i32_0 : i32, i32
  }
  func.func @transform_5(%arg0: i32) -> (i32, i32) {
    %c0_i32 = arith.constant 0 : i32
    %c0_i32_0 = arith.constant 0 : i32
    %c0_i32_1 = arith.constant 0 : i32
    return %c0_i32, %c0_i32_0 : i32, i32
  }
  func.func @transform_6(%arg0: i32) -> (i32, i32) {
    %c0_i32 = arith.constant 0 : i32
    %c0_i32_0 = arith.constant 0 : i32
    %c0_i32_1 = arith.constant 0 : i32
    return %c0_i32, %c0_i32_0 : i32, i32
  }
  func.func @transform_7(%arg0: i32) -> (i32, i32) {
    %c0_i32 = arith.constant 0 : i32
    %c0_i32_0 = arith.constant 0 : i32
    %c0_i32_1 = arith.constant 0 : i32
    return %c0_i32, %c0_i32_0 : i32, i32
  }
  func.func @transform_8(%arg0: i32) -> (i32, i32) {
    %c0_i32 = arith.constant 0 : i32
    %c0_i32_0 = arith.constant 0 : i32
    %c0_i32_1 = arith.constant 0 : i32
    return %c0_i32, %c0_i32_0 : i32, i32
  }
  func.func @transform_9(%arg0: i32) -> (i32, i32) {
    %c0_i32 = arith.constant 0 : i32
    %c0_i32_0 = arith.constant 0 : i32
    return %arg0, %c0_i32 : i32, i32
  }
}

</mosaic_0001>

<bundles_post_ra>
// kernel: _ann_forward_jit.1
= control target key start
LH: loop header
LB: loop body
LE: loop exit
PB: predicated region body
PF: predicated region fallthrough
CT: control target
= control target key end

     0   :  { %14 = vsyncpa [#allocation3], 0  ;;  %s1025_s0 = inlined_call_operand.vmem [shape: bf16[16,128], index: 0, kind: input, shape index: {}]   ;;  %s1026_s1 = inlined_call_operand.hbm [shape: bf16[128,128], index: 1, kind: input, shape index: {}]   ;;  %s1027_s2 = inlined_call_operand.vmem [shape: f32[1,128], index: 2, kind: input, shape index: {}]   ;;  %s1028_s3 = inlined_call_operand.hbm [shape: bf16[128,128], index: 3, kind: input, shape index: {}]   ;;  %s1029_s4 = inlined_call_operand.vmem [shape: f32[1,128], index: 4, kind: input, shape index: {}]   ;;  %s1030_s5 = inlined_call_operand.hbm [shape: bf16[128,128], index: 5, kind: input, shape index: {}]   ;;  %s1031_s6 = inlined_call_operand.vmem [shape: f32[1,128], index: 6, kind: input, shape index: {}]   ;;  %s1032_s7 = inlined_call_operand.hbm [shape: bf16[128,128], index: 7, kind: input, shape index: {}]   ;;  %s1033_s8 = inlined_call_operand.vmem [shape: f32[1,128], index: 8, kind: input, shape index: {}]   ;;  %s1034_s9 = inlined_call_operand.vmem [shape: bf16[16,128], index: 9, kind: output, shape index: {}]  }
   0x1   :  { %15 = vsyncpa [#allocation5], 0 }
   0x2   :  { %16 = vsyncpa [#allocation8], 0  ;;  %s885_s30 = smov [#allocation4]   ;;  %s886_s11 = smov [#allocation2]  }
   0x3   :  { %s38_s10 = sshll.u32 %s885_s30, 4  ;;  %s24_s12 = sshll.u32 %s886_s11, 4  ;;  %s39_s10 = int_to_ptr.vmem [resolvable:$true] %s38_s10  ;;  %s25_s12 = int_to_ptr.vmem [resolvable:$true] %s24_s12 }
   0x4   :  { %s807_s13 = scalar_lea.vmem %s39_s10, 1024  ;;  %p812_p1 = scmp.lt.s32.totalorder %s39_s10, %s39_s10 }
   0x5   :  { %p808_p0 = scmp.ne.s32.totalorder %s39_s10, %s807_s13  ;;  %p813_p2 = scmp.lt.s32.totalorder %s807_s13, %s807_s13 }
   0x7   :  { %p814_p3 = por %p813_p2, %p812_p1 }
   0x9   :  { %p815_p4 = pnand %p814_p3, %p808_p0 }
   0xb   :  { %818 = shalt.err (!%p815_p4)
}
   0xc   :  { %s887_s14 = smov 64   ;;  %s888_s15 = smov 4  }
   0xd   :  { %44 = dma.hbm_to_vmem [thread:$0]  %s1028_s3, 1024, %s39_s10, [#allocation5], %s887_s14, %s887_s14, %s888_s15  }
   0xe   :  { %s827_s18 = scalar_lea.vmem %s25_s12, 1024  ;;  %p832_p6 = scmp.lt.s32.totalorder %s25_s12, %s25_s12 }
   0xf   :  { %p828_p5 = scmp.ne.s32.totalorder %s25_s12, %s827_s18  ;;  %p833_p7 = scmp.lt.s32.totalorder %s827_s18, %s827_s18 }
  0x11   :  { %p834_p8 = por %p833_p7, %p832_p6 }
  0x13   :  { %p835_p9 = pnand %p834_p8, %p828_p5 }
  0x15   :  { %838 = shalt.err (!%p835_p9)
}
  0x16   :  { %30 = dma.hbm_to_vmem [thread:$0]  %s1026_s1, 1024, %s25_s12, [#allocation3], %s887_s14, %s887_s14, %s888_s15  }
  0x17   :  { %s889_s21 = smov [#allocation6]   ;;  %s890_s23 = smov [#allocation7]  }
  0x18   :  { %s52_s22 = sshll.u32 %s889_s21, 4  ;;  %s66_s24 = sshll.u32 %s890_s23, 4  ;;  %s53_s22 = int_to_ptr.vmem [resolvable:$true] %s52_s22  ;;  %s67_s24 = int_to_ptr.vmem [resolvable:$true] %s66_s24 }
  0x19   :  { %s847_s3 = scalar_lea.vmem %s53_s22, 1024  ;;  %p852_p11 = scmp.lt.s32.totalorder %s53_s22, %s53_s22 }
  0x1a   :  { %p848_p10 = scmp.ne.s32.totalorder %s53_s22, %s847_s3  ;;  %p853_p12 = scmp.lt.s32.totalorder %s847_s3, %s847_s3 }
  0x1c   :  { %p854_p13 = por %p853_p12, %p852_p11 }
  0x1e   :  { %p855_p0 = pnand %p854_p13, %p848_p10 }
  0x20   :  { %858 = shalt.err (!%p855_p0)
}
  0x21   :  { %58 = dma.hbm_to_vmem [thread:$0]  %s1030_s5, 1024, %s53_s22, [#allocation5], %s887_s14, %s887_s14, %s888_s15  }
  0x22   :  { %s867_s1 = scalar_lea.vmem %s67_s24, 1024  ;;  %p872_p2 = scmp.lt.s32.totalorder %s67_s24, %s67_s24 }
  0x23   :  { %p868_p1 = scmp.ne.s32.totalorder %s67_s24, %s867_s1  ;;  %p873_p3 = scmp.lt.s32.totalorder %s867_s1, %s867_s1 }
  0x25   :  { %p874_p4 = por %p873_p3, %p872_p2 }
  0x27   :  { %p875_p5 = pnand %p874_p4, %p868_p1 }
  0x29   :  { %878 = shalt.err (!%p875_p5)
}
  0x2a   :  { %72 = dma.hbm_to_vmem [thread:$0]  %s1032_s7, 1024, %s67_s24, [#allocation8], %s887_s14, %s887_s14, %s888_s15  }
  0x2b   :  { %879 = dma.done.wait [#allocation3], 1024  }
  0x2c   :  { %880 = vsyncadd [#allocation3], 4294966272 }
  0x2d   :  { %881 = dma.done.wait [#allocation5], 2048  }
  0x2e   :  { %882 = vsyncadd [#allocation5], 4294965248 }
  0x2f   :  { %883 = dma.done.wait [#allocation8], 1024  }
  0x30   :  { %884 = vsyncadd [#allocation8], 4294966272  ;;  %v891_v0 = vmov 0.0   ;;  %vm892_vm0 = vmmov 0   ;;  %v758_v1 = vld [vmem:[#allocation2 + $0x38] sm:$0xff]   ;;  %v759_v2 = vld [vmem:[#allocation2 + $0x30] sm:$0xff]  }
  0x31   :  { %670 = vmatprep.subr.bf16.mxu0 %v891_v0  ;;  %686 = vmatprep.mubr.msk.bf16.mxu0 %vm892_vm0, %v891_v0  ;;  %v760_v3 = vld [vmem:[#allocation2 + $0x28] sm:$0xff]   ;;  %v767_v4 = vld [vmem:[#allocation4 + $0x38] sm:$0xff]   ;;  %v761_v5 = vld [vmem:[#allocation2 + $0x20] sm:$0xff]  }
  0x32   :  { %690 = vmatprep.subr.bf16.mxu1 %v891_v0  ;;  %706 = vmatprep.mubr.msk.bf16.mxu1 %vm892_vm0, %v891_v0  ;;  %v768_v6 = vld [vmem:[#allocation4 + $0x30] sm:$0xff]   ;;  %v762_v7 = vld [vmem:[#allocation2 + $0x18] sm:$0xff]   ;;  %v769_v8 = vld [vmem:[#allocation4 + $0x28] sm:$0xff]  }
  0x33   :  { %671 = vmatpush3.bf16.msra.mxu0 %v758_v1  ;;  %691 = vmatpush3.bf16.msra.mxu1 %v767_v4  ;;  %v763_v9 = vld [vmem:[#allocation2 + $0x10] sm:$0xff]   ;;  %v770_v10 = vld [vmem:[#allocation4 + $0x20] sm:$0xff]   ;;  %v764_v11 = vld [vmem:[#allocation2 + $0x8] sm:$0xff]  }
  0x34   :  { %672 = vmatprep.subr.bf16.mxu0 %v891_v0  ;;  %692 = vmatprep.subr.bf16.mxu1 %v891_v0  ;;  %v771_v12 = vld [vmem:[#allocation4 + $0x18] sm:$0xff]   ;;  %v765_v13 = vld [vmem:[#allocation2] sm:$0xff]   ;;  %v772_v15 = vld [vmem:[#allocation4 + $0x10] sm:$0xff]  }
  0x35   :  { %v766_v14 = vld [vmem:[%s1025_s0] sm:$0xff]   ;;  %v773_v16 = vld [vmem:[#allocation4 + $0x8] sm:$0xff]   ;;  %v775_v18 = vld [vmem:[#allocation6 + $0x38] sm:$0xff]  }
  0x36   :  { %v774_v17 = vld [vmem:[#allocation4] sm:$0xff]   ;;  %v776_v19 = vld [vmem:[#allocation6 + $0x30] sm:$0xff]   ;;  %v777_v20 = vld [vmem:[#allocation6 + $0x28] sm:$0xff]  }
  0x37   :  { %673 = vmatpush3.bf16.msra.mxu0 %v759_v2  ;;  %693 = vmatpush3.bf16.msra.mxu1 %v768_v6  ;;  %v778_v21 = vld [vmem:[#allocation6 + $0x20] sm:$0xff]   ;;  %v779_v22 = vld [vmem:[#allocation6 + $0x18] sm:$0xff]   ;;  %v780_v33 = vld [vmem:[#allocation6 + $0x10] sm:$0xff]  }
  0x38   :  { %674 = vmatprep.subr.bf16.mxu0 %v891_v0  ;;  %694 = vmatprep.subr.bf16.mxu1 %v891_v0  ;;  %v588_v23 = vld [vmem:[%s1027_s2] ss:$0 sm:$0xff]  ;;  %v781_v34 = vld [vmem:[#allocation6 + $0x8] sm:$0xff]   ;;  %v783_v36 = vld [vmem:[#allocation7 + $0x38] sm:$0xff]  }
  0x39   :  { %v782_v35 = vld [vmem:[#allocation6] sm:$0xff]   ;;  %v784_v37 = vld [vmem:[#allocation7 + $0x30] sm:$0xff]   ;;  %v785_v38 = vld [vmem:[#allocation7 + $0x28] sm:$0xff]  }
  0x3a   :  { %v786_v39 = vld [vmem:[#allocation7 + $0x20] sm:$0xff]   ;;  %v787_v40 = vld [vmem:[#allocation7 + $0x18] sm:$0xff]   ;;  %v788_v51 = vld [vmem:[#allocation7 + $0x10] sm:$0xff]  }
  0x3b   :  { %675 = vmatpush3.bf16.msra.mxu0 %v760_v3  ;;  %695 = vmatpush3.bf16.msra.mxu1 %v769_v8  ;;  %v598_v41 = vld [vmem:[%s1029_s4] ss:$0 sm:$0xff]  ;;  %v789_v52 = vld [vmem:[#allocation7 + $0x8] sm:$0xff]  }
  0x3c   :  { %676 = vmatprep.subr.bf16.mxu0 %v891_v0  ;;  %696 = vmatprep.subr.bf16.mxu1 %v891_v0  ;;  %v790_v53 = vld [vmem:[#allocation7] sm:$0xff]  }
  0x3d   :  { %v607_v54 = vld [vmem:[%s1031_s6] ss:$0 sm:$0xff] }
  0x3f   :  { %677 = vmatpush3.bf16.msra.mxu0 %v761_v5  ;;  %697 = vmatpush3.bf16.msra.mxu1 %v770_v10 }
  0x40   :  { %678 = vmatprep.subr.bf16.mxu0 %v891_v0  ;;  %698 = vmatprep.subr.bf16.mxu1 %v891_v0 }
  0x43   :  { %679 = vmatpush3.bf16.msra.mxu0 %v762_v7  ;;  %699 = vmatpush3.bf16.msra.mxu1 %v771_v12 }
  0x44   :  { %680 = vmatprep.subr.bf16.mxu0 %v891_v0  ;;  %700 = vmatprep.subr.bf16.mxu1 %v891_v0 }
  0x47   :  { %681 = vmatpush3.bf16.msra.mxu0 %v763_v9  ;;  %701 = vmatpush3.bf16.msra.mxu1 %v772_v15 }
  0x48   :  { %682 = vmatprep.subr.bf16.mxu0 %v891_v0  ;;  %702 = vmatprep.subr.bf16.mxu1 %v891_v0 }
  0x4b   :  { %683 = vmatpush3.bf16.msra.mxu0 %v764_v11  ;;  %703 = vmatpush3.bf16.msra.mxu1 %v773_v16 }
  0x4c   :  { %684 = vmatprep.subr.bf16.mxu0 %v891_v0  ;;  %704 = vmatprep.subr.bf16.mxu1 %v891_v0 }
  0x4f   :  { %685 = vmatpush3.bf16.msra.mxu0 %v765_v13  ;;  %705 = vmatpush3.bf16.msra.mxu1 %v774_v17 }
  0x50   :  { %710 = vmatprep.subr.bf16.mxu0 %v891_v0  ;;  %730 = vmatprep.subr.bf16.mxu1 %v891_v0 }
  0x52   :  { %687 = vmatmul.mubr.bf16.vlgmr.msra.gmra.mxu0 %v766_v14 }
  0x53   :  { %726 = vmatprep.mubr.msk.bf16.mxu0 %vm892_vm0, %v891_v0  ;;  %711 = vmatpush3.bf16.msra.mxu0 %v775_v18 }
  0x54   :  { %712 = vmatprep.subr.bf16.mxu0 %v891_v0 }
  0x57   :  { %713 = vmatpush3.bf16.msra.mxu0 %v776_v19 }
  0x58   :  { %714 = vmatprep.subr.bf16.mxu0 %v891_v0 }
  0x5b   :  { %715 = vmatpush3.bf16.msra.mxu0 %v777_v20 }
  0x5c   :  { %716 = vmatprep.subr.bf16.mxu0 %v891_v0 }
  0x5f   :  { %717 = vmatpush3.bf16.msra.mxu0 %v778_v21 }
  0x60   :  { %718 = vmatprep.subr.bf16.mxu0 %v891_v0 }
  0x63   :  { %719 = vmatpush3.bf16.msra.mxu0 %v779_v22 }
  0x64   :  { %720 = vmatprep.subr.bf16.mxu0 %v891_v0 }
  0x67   :  { %721 = vmatpush3.bf16.msra.mxu0 %v780_v33 }
  0x68   :  { %722 = vmatprep.subr.bf16.mxu0 %v891_v0 }
  0x6b   :  { %723 = vmatpush3.bf16.msra.mxu0 %v781_v34 }
  0x6c   :  { %724 = vmatprep.subr.bf16.mxu0 %v891_v0 }
  0x6f   :  { %725 = vmatpush3.bf16.msra.mxu0 %v782_v35 }
 0x112   :  { %v201_v24 = vpop.f32.mrf.mxu0 }
 0x113   :  { %v202_v26 = vadd.f32 %v588_v23, %v201_v24 }
 0x114   :  { %v688_v25 = vpop.f32.mrf.mxu0 }
 0x115   :  { %v208_v30 = vmax.f32 %v202_v26, 0.0 }
 0x116   :  { %v204_v27 = vpop.f32.mrf.mxu0 }
 0x117   :  { %v205_v28 = vadd.f32 %v588_v23, %v204_v27 }
 0x118   :  { %v689_v29 = vpop.f32.mrf.mxu0 }
 0x119   :  { %v209_v31 = vmax.f32 %v205_v28, 0.0 }
 0x11b   :  { %v210_v32 = vpack.c.bf16 %v209_v31, %v208_v30 }
 0x11d   :  { %707 = vmatmul.mubr.bf16.vlgmr.msra.gmra.mxu1 %v210_v32 }
 0x11e   :  { %746 = vmatprep.mubr.msk.bf16.mxu1 %vm892_vm0, %v891_v0  ;;  %731 = vmatpush3.bf16.msra.mxu1 %v783_v36 }
 0x11f   :  { %732 = vmatprep.subr.bf16.mxu1 %v891_v0 }
 0x122   :  { %733 = vmatpush3.bf16.msra.mxu1 %v784_v37 }
 0x123   :  { %734 = vmatprep.subr.bf16.mxu1 %v891_v0 }
 0x126   :  { %735 = vmatpush3.bf16.msra.mxu1 %v785_v38 }
 0x127   :  { %736 = vmatprep.subr.bf16.mxu1 %v891_v0 }
 0x12a   :  { %737 = vmatpush3.bf16.msra.mxu1 %v786_v39 }
 0x12b   :  { %738 = vmatprep.subr.bf16.mxu1 %v891_v0 }
 0x12e   :  { %739 = vmatpush3.bf16.msra.mxu1 %v787_v40 }
 0x12f   :  { %740 = vmatprep.subr.bf16.mxu1 %v891_v0 }
 0x132   :  { %741 = vmatpush3.bf16.msra.mxu1 %v788_v51 }
 0x133   :  { %742 = vmatprep.subr.bf16.mxu1 %v891_v0 }
 0x136   :  { %743 = vmatpush3.bf16.msra.mxu1 %v789_v52 }
 0x137   :  { %744 = vmatprep.subr.bf16.mxu1 %v891_v0  ;;  %v616_v0 = vld [vmem:[%s1033_s8] ss:$0 sm:$0xff] }
 0x13a   :  { %745 = vmatpush3.bf16.msra.mxu1 %v790_v53 }
 0x1dd   :  { %v316_v42 = vpop.f32.mrf.mxu1 }
 0x1de   :  { %v317_v44 = vadd.f32 %v598_v41, %v316_v42 }
 0x1df   :  { %v708_v43 = vpop.f32.mrf.mxu1 }
 0x1e0   :  { %v323_v48 = vmax.f32 %v317_v44, 0.0 }
 0x1e1   :  { %v319_v45 = vpop.f32.mrf.mxu1 }
 0x1e2   :  { %v320_v46 = vadd.f32 %v598_v41, %v319_v45 }
 0x1e3   :  { %v709_v47 = vpop.f32.mrf.mxu1 }
 0x1e4   :  { %v324_v49 = vmax.f32 %v320_v46, 0.0 }
 0x1e6   :  { %v325_v50 = vpack.c.bf16 %v324_v49, %v323_v48 }
 0x1e8   :  { %727 = vmatmul.mubr.bf16.vlgmr.msra.gmra.mxu0 %v325_v50 }
 0x2a8   :  { %v431_v55 = vpop.f32.mrf.mxu0 }
 0x2a9   :  { %v432_v57 = vadd.f32 %v607_v54, %v431_v55 }
 0x2aa   :  { %v728_v56 = vpop.f32.mrf.mxu0 }
 0x2ab   :  { %v438_v61 = vmax.f32 %v432_v57, 0.0 }
 0x2ac   :  { %v434_v58 = vpop.f32.mrf.mxu0 }
 0x2ad   :  { %v435_v59 = vadd.f32 %v607_v54, %v434_v58 }
 0x2ae   :  { %v729_v60 = vpop.f32.mrf.mxu0 }
 0x2af   :  { %v439_v62 = vmax.f32 %v435_v59, 0.0 }
 0x2b1   :  { %v440_v63 = vpack.c.bf16 %v439_v62, %v438_v61 }
 0x2b3   :  { %747 = vmatmul.mubr.bf16.vlgmr.msra.gmra.mxu1 %v440_v63 }
 0x373   :  { %v546_v1 = vpop.f32.mrf.mxu1 }
 0x374   :  { %v547_v2 = vadd.f32 %v616_v0, %v546_v1 }
 0x375   :  { %v748_v3 = vpop.f32.mrf.mxu1 }
 0x376   :  { %553 = vmax.xlane.f32.xlu0 %v547_v2 }
 0x377   :  { %v549_v4 = vpop.f32.mrf.mxu1 }
 0x378   :  { %v550_v5 = vadd.f32 %v616_v0, %v549_v4 }
 0x379   :  { %v749_v6 = vpop.f32.mrf.mxu1 }
 0x37a   :  { %555 = vmax.xlane.f32.xlu0 %v550_v5 }
 0x3ff   :  { %v554_v7 = vpop.xlane.xlu0 %553 }
 0x400   :  { %v557_v8 = vsub.f32 %v547_v2, %v554_v7 }
 0x402   :  { %v559_v9 = vmul.f32 1.442695, %v557_v8 }
 0x403   :  { %v556_v10 = vpop.xlane.xlu0 %555 }
 0x404   :  { %791 = vpow2.f32 %v559_v9  ;;  %v558_v11 = vsub.f32 %v550_v5, %v556_v10 }
 0x406   :  { %v561_v12 = vmul.f32 1.442695, %v558_v11 }
 0x408   :  { %793 = vpow2.f32 %v561_v12 }
 0x411   :  { %v792_v13 = vpop.eup %791 }
 0x412   :  { %563 = vadd.xlane.f32.xlu1 %v792_v13 }
 0x415   :  { %v794_v14 = vpop.eup %793 }
 0x416   :  { %565 = vadd.xlane.f32.xlu1 %v794_v14 }
 0x49b   :  { %v564_v15 = vpop.xlane.xlu1 %563 }
 0x49c   :  { %795 = vrcp.f32 %v564_v15 }
 0x49f   :  { %v566_v16 = vpop.xlane.xlu1 %565 }
 0x4a0   :  { %797 = vrcp.f32 %v566_v16 }
 0x4a9   :  { %v796_v17 = vpop.eup %795 }
 0x4aa   :  { %v569_v19 = vmul.f32 %v796_v17, %v792_v13 }
 0x4ad   :  { %v798_v18 = vpop.eup %797 }
 0x4ae   :  { %v570_v20 = vmul.f32 %v798_v18, %v794_v14 }
 0x4b0   :  { %v632_v21 = vpack.c.bf16 %v570_v20, %v569_v19 }
 0x4b2   :  { %633 = vst [vmem:[%s1034_s9] sm:$0xff] %v632_v21  }
 0x4b3   :  { %585 = vsyncpa [#allocation3], 1 }
 0x4b4   :  { %586 = vsyncpa [#allocation5], 1 }
 0x4b5   :  { %587 = vsyncpa [#allocation8], 1 }

// kernel: _ann_forward_jit.1
= control target key start
LH: loop header
LB: loop body
LE: loop exit
PB: predicated region body
PF: predicated region fallthrough
CT: control target
= control target key end

     0   :  { %14 = vsyncpa [#allocation3], 0  ;;  %s1025_s0 = inlined_call_operand.vmem [shape: bf16[16,128], index: 0, kind: input, shape index: {}]   ;;  %s1026_s1 = inlined_call_operand.hbm [shape: bf16[128,128], index: 1, kind: input, shape index: {}]   ;;  %s1027_s2 = inlined_call_operand.vmem [shape: f32[1,128], index: 2, kind: input, shape index: {}]   ;;  %s1028_s3 = inlined_call_operand.hbm [shape: bf16[128,128], index: 3, kind: input, shape index: {}]   ;;  %s1029_s4 = inlined_call_operand.vmem [shape: f32[1,128], index: 4, kind: input, shape index: {}]   ;;  %s1030_s5 = inlined_call_operand.hbm [shape: bf16[128,128], index: 5, kind: input, shape index: {}]   ;;  %s1031_s6 = inlined_call_operand.vmem [shape: f32[1,128], index: 6, kind: input, shape index: {}]   ;;  %s1032_s7 = inlined_call_operand.hbm [shape: bf16[128,128], index: 7, kind: input, shape index: {}]   ;;  %s1033_s8 = inlined_call_operand.vmem [shape: f32[1,128], index: 8, kind: input, shape index: {}]   ;;  %s1034_s9 = inlined_call_operand.vmem [shape: bf16[16,128], index: 9, kind: output, shape index: {}]  }
   0x1   :  { %15 = vsyncpa [#allocation5], 0 }
   0x2   :  { %16 = vsyncpa [#allocation8], 0  ;;  %s885_s30 = smov [#allocation4]   ;;  %s886_s11 = smov [#allocation2]  }
   0x3   :  { %s38_s10 = sshll.u32 %s885_s30, 4  ;;  %s24_s12 = sshll.u32 %s886_s11, 4  ;;  %s39_s10 = int_to_ptr.vmem [resolvable:$true] %s38_s10  ;;  %s25_s12 = int_to_ptr.vmem [resolvable:$true] %s24_s12 }
   0x4   :  { %s807_s13 = scalar_lea.vmem %s39_s10, 1024  ;;  %p812_p1 = scmp.lt.s32.totalorder %s39_s10, %s39_s10 }
   0x5   :  { %p808_p0 = scmp.ne.s32.totalorder %s39_s10, %s807_s13  ;;  %p813_p2 = scmp.lt.s32.totalorder %s807_s13, %s807_s13 }
   0x7   :  { %p814_p3 = por %p813_p2, %p812_p1 }
   0x9   :  { %p815_p4 = pnand %p814_p3, %p808_p0 }
   0xb   :  { %818 = shalt.err (!%p815_p4)
}
   0xc   :  { %s887_s14 = smov 64   ;;  %s888_s15 = smov 4  }
   0xd   :  { %44 = dma.hbm_to_vmem [thread:$0]  %s1028_s3, 1024, %s39_s10, [#allocation5], %s887_s14, %s887_s14, %s888_s15  }
   0xe   :  { %s827_s18 = scalar_lea.vmem %s25_s12, 1024  ;;  %p832_p6 = scmp.lt.s32.totalorder %s25_s12, %s25_s12 }
   0xf   :  { %p828_p5 = scmp.ne.s32.totalorder %s25_s12, %s827_s18  ;;  %p833_p7 = scmp.lt.s32.totalorder %s827_s18, %s827_s18 }
  0x11   :  { %p834_p8 = por %p833_p7, %p832_p6 }
  0x13   :  { %p835_p9 = pnand %p834_p8, %p828_p5 }
  0x15   :  { %838 = shalt.err (!%p835_p9)
}
  0x16   :  { %30 = dma.hbm_to_vmem [thread:$0]  %s1026_s1, 1024, %s25_s12, [#allocation3], %s887_s14, %s887_s14, %s888_s15  }
  0x17   :  { %s889_s21 = smov [#allocation6]   ;;  %s890_s23 = smov [#allocation7]  }
  0x18   :  { %s52_s22 = sshll.u32 %s889_s21, 4  ;;  %s66_s24 = sshll.u32 %s890_s23, 4  ;;  %s53_s22 = int_to_ptr.vmem [resolvable:$true] %s52_s22  ;;  %s67_s24 = int_to_ptr.vmem [resolvable:$true] %s66_s24 }
  0x19   :  { %s847_s3 = scalar_lea.vmem %s53_s22, 1024  ;;  %p852_p11 = scmp.lt.s32.totalorder %s53_s22, %s53_s22 }
  0x1a   :  { %p848_p10 = scmp.ne.s32.totalorder %s53_s22, %s847_s3  ;;  %p853_p12 = scmp.lt.s32.totalorder %s847_s3, %s847_s3 }
  0x1c   :  { %p854_p13 = por %p853_p12, %p852_p11 }
  0x1e   :  { %p855_p0 = pnand %p854_p13, %p848_p10 }
  0x20   :  { %858 = shalt.err (!%p855_p0)
}
  0x21   :  { %58 = dma.hbm_to_vmem [thread:$0]  %s1030_s5, 1024, %s53_s22, [#allocation5], %s887_s14, %s887_s14, %s888_s15  }
  0x22   :  { %s867_s1 = scalar_lea.vmem %s67_s24, 1024  ;;  %p872_p2 = scmp.lt.s32.totalorder %s67_s24, %s67_s24 }
  0x23   :  { %p868_p1 = scmp.ne.s32.totalorder %s67_s24, %s867_s1  ;;  %p873_p3 = scmp.lt.s32.totalorder %s867_s1, %s867_s1 }
  0x25   :  { %p874_p4 = por %p873_p3, %p872_p2 }
  0x27   :  { %p875_p5 = pnand %p874_p4, %p868_p1 }
  0x29   :  { %878 = shalt.err (!%p875_p5)
}
  0x2a   :  { %72 = dma.hbm_to_vmem [thread:$0]  %s1032_s7, 1024, %s67_s24, [#allocation8], %s887_s14, %s887_s14, %s888_s15  }
  0x2b   :  { %879 = dma.done.wait [#allocation3], 1024  }
  0x2c   :  { %880 = vsyncadd [#allocation3], 4294966272 }
  0x2d   :  { %881 = dma.done.wait [#allocation5], 2048  }
  0x2e   :  { %882 = vsyncadd [#allocation5], 4294965248 }
  0x2f   :  { %883 = dma.done.wait [#allocation8], 1024  }
  0x30   :  { %884 = vsyncadd [#allocation8], 4294966272  ;;  %v891_v0 = vmov 0.0   ;;  %vm892_vm0 = vmmov 0   ;;  %v758_v1 = vld [vmem:[#allocation2 + $0x38] sm:$0xff]   ;;  %v759_v2 = vld [vmem:[#allocation2 + $0x30] sm:$0xff]  }
  0x31   :  { %670 = vmatprep.subr.bf16.mxu0 %v891_v0  ;;  %686 = vmatprep.mubr.msk.bf16.mxu0 %vm892_vm0, %v891_v0  ;;  %v760_v3 = vld [vmem:[#allocation2 + $0x28] sm:$0xff]   ;;  %v767_v4 = vld [vmem:[#allocation4 + $0x38] sm:$0xff]   ;;  %v761_v5 = vld [vmem:[#allocation2 + $0x20] sm:$0xff]  }
  0x32   :  { %690 = vmatprep.subr.bf16.mxu1 %v891_v0  ;;  %706 = vmatprep.mubr.msk.bf16.mxu1 %vm892_vm0, %v891_v0  ;;  %v768_v6 = vld [vmem:[#allocation4 + $0x30] sm:$0xff]   ;;  %v762_v7 = vld [vmem:[#allocation2 + $0x18] sm:$0xff]   ;;  %v769_v8 = vld [vmem:[#allocation4 + $0x28] sm:$0xff]  }
  0x33   :  { %671 = vmatpush3.bf16.msra.mxu0 %v758_v1  ;;  %691 = vmatpush3.bf16.msra.mxu1 %v767_v4  ;;  %v763_v9 = vld [vmem:[#allocation2 + $0x10] sm:$0xff]   ;;  %v770_v10 = vld [vmem:[#allocation4 + $0x20] sm:$0xff]   ;;  %v764_v11 = vld [vmem:[#allocation2 + $0x8] sm:$0xff]  }
  0x34   :  { %672 = vmatprep.subr.bf16.mxu0 %v891_v0  ;;  %692 = vmatprep.subr.bf16.mxu1 %v891_v0  ;;  %v771_v12 = vld [vmem:[#allocation4 + $0x18] sm:$0xff]   ;;  %v765_v13 = vld [vmem:[#allocation2] sm:$0xff]   ;;  %v772_v15 = vld [vmem:[#allocation4 + $0x10] sm:$0xff]  }
  0x35   :  { %v766_v14 = vld [vmem:[%s1025_s0] sm:$0xff]   ;;  %v773_v16 = vld [vmem:[#allocation4 + $0x8] sm:$0xff]   ;;  %v775_v18 = vld [vmem:[#allocation6 + $0x38] sm:$0xff]  }
  0x36   :  { %v774_v17 = vld [vmem:[#allocation4] sm:$0xff]   ;;  %v776_v19 = vld [vmem:[#allocation6 + $0x30] sm:$0xff]   ;;  %v777_v20 = vld [vmem:[#allocation6 + $0x28] sm:$0xff]  }
  0x37   :  { %673 = vmatpush3.bf16.msra.mxu0 %v759_v2  ;;  %693 = vmatpush3.bf16.msra.mxu1 %v768_v6  ;;  %v778_v21 = vld [vmem:[#allocation6 + $0x20] sm:$0xff]   ;;  %v779_v22 = vld [vmem:[#allocation6 + $0x18] sm:$0xff]   ;;  %v780_v33 = vld [vmem:[#allocation6 + $0x10] sm:$0xff]  }
  0x38   :  { %674 = vmatprep.subr.bf16.mxu0 %v891_v0  ;;  %694 = vmatprep.subr.bf16.mxu1 %v891_v0  ;;  %v588_v23 = vld [vmem:[%s1027_s2] ss:$0 sm:$0xff]  ;;  %v781_v34 = vld [vmem:[#allocation6 + $0x8] sm:$0xff]   ;;  %v783_v36 = vld [vmem:[#allocation7 + $0x38] sm:$0xff]  }
  0x39   :  { %v782_v35 = vld [vmem:[#allocation6] sm:$0xff]   ;;  %v784_v37 = vld [vmem:[#allocation7 + $0x30] sm:$0xff]   ;;  %v785_v38 = vld [vmem:[#allocation7 + $0x28] sm:$0xff]  }
  0x3a   :  { %v786_v39 = vld [vmem:[#allocation7 + $0x20] sm:$0xff]   ;;  %v787_v40 = vld [vmem:[#allocation7 + $0x18] sm:$0xff]   ;;  %v788_v51 = vld [vmem:[#allocation7 + $0x10] sm:$0xff]  }
  0x3b   :  { %675 = vmatpush3.bf16.msra.mxu0 %v760_v3  ;;  %695 = vmatpush3.bf16.msra.mxu1 %v769_v8  ;;  %v598_v41 = vld [vmem:[%s1029_s4] ss:$0 sm:$0xff]  ;;  %v789_v52 = vld [vmem:[#allocation7 + $0x8] sm:$0xff]  }
  0x3c   :  { %676 = vmatprep.subr.bf16.mxu0 %v891_v0  ;;  %696 = vmatprep.subr.bf16.mxu1 %v891_v0  ;;  %v790_v53 = vld [vmem:[#allocation7] sm:$0xff]  }
  0x3d   :  { %v607_v54 = vld [vmem:[%s1031_s6] ss:$0 sm:$0xff] }
  0x3f   :  { %677 = vmatpush3.bf16.msra.mxu0 %v761_v5  ;;  %697 = vmatpush3.bf16.msra.mxu1 %v770_v10 }
  0x40   :  { %678 = vmatprep.subr.bf16.mxu0 %v891_v0  ;;  %698 = vmatprep.subr.bf16.mxu1 %v891_v0 }
  0x43   :  { %679 = vmatpush3.bf16.msra.mxu0 %v762_v7  ;;  %699 = vmatpush3.bf16.msra.mxu1 %v771_v12 }
  0x44   :  { %680 = vmatprep.subr.bf16.mxu0 %v891_v0  ;;  %700 = vmatprep.subr.bf16.mxu1 %v891_v0 }
  0x47   :  { %681 = vmatpush3.bf16.msra.mxu0 %v763_v9  ;;  %701 = vmatpush3.bf16.msra.mxu1 %v772_v15 }
  0x48   :  { %682 = vmatprep.subr.bf16.mxu0 %v891_v0  ;;  %702 = vmatprep.subr.bf16.mxu1 %v891_v0 }
  0x4b   :  { %683 = vmatpush3.bf16.msra.mxu0 %v764_v11  ;;  %703 = vmatpush3.bf16.msra.mxu1 %v773_v16 }
  0x4c   :  { %684 = vmatprep.subr.bf16.mxu0 %v891_v0  ;;  %704 = vmatprep.subr.bf16.mxu1 %v891_v0 }
  0x4f   :  { %685 = vmatpush3.bf16.msra.mxu0 %v765_v13  ;;  %705 = vmatpush3.bf16.msra.mxu1 %v774_v17 }
  0x50   :  { %710 = vmatprep.subr.bf16.mxu0 %v891_v0  ;;  %730 = vmatprep.subr.bf16.mxu1 %v891_v0 }
  0x52   :  { %687 = vmatmul.mubr.bf16.vlgmr.msra.gmra.mxu0 %v766_v14 }
  0x53   :  { %726 = vmatprep.mubr.msk.bf16.mxu0 %vm892_vm0, %v891_v0  ;;  %711 = vmatpush3.bf16.msra.mxu0 %v775_v18 }
  0x54   :  { %712 = vmatprep.subr.bf16.mxu0 %v891_v0 }
  0x57   :  { %713 = vmatpush3.bf16.msra.mxu0 %v776_v19 }
  0x58   :  { %714 = vmatprep.subr.bf16.mxu0 %v891_v0 }
  0x5b   :  { %715 = vmatpush3.bf16.msra.mxu0 %v777_v20 }
  0x5c   :  { %716 = vmatprep.subr.bf16.mxu0 %v891_v0 }
  0x5f   :  { %717 = vmatpush3.bf16.msra.mxu0 %v778_v21 }
  0x60   :  { %718 = vmatprep.subr.bf16.mxu0 %v891_v0 }
  0x63   :  { %719 = vmatpush3.bf16.msra.mxu0 %v779_v22 }
  0x64   :  { %720 = vmatprep.subr.bf16.mxu0 %v891_v0 }
  0x67   :  { %721 = vmatpush3.bf16.msra.mxu0 %v780_v33 }
  0x68   :  { %722 = vmatprep.subr.bf16.mxu0 %v891_v0 }
  0x6b   :  { %723 = vmatpush3.bf16.msra.mxu0 %v781_v34 }
  0x6c   :  { %724 = vmatprep.subr.bf16.mxu0 %v891_v0 }
  0x6f   :  { %725 = vmatpush3.bf16.msra.mxu0 %v782_v35 }
 0x112   :  { %v201_v24 = vpop.f32.mrf.mxu0 }
 0x113   :  { %v202_v26 = vadd.f32 %v588_v23, %v201_v24 }
 0x114   :  { %v688_v25 = vpop.f32.mrf.mxu0 }
 0x115   :  { %v208_v30 = vmax.f32 %v202_v26, 0.0 }
 0x116   :  { %v204_v27 = vpop.f32.mrf.mxu0 }
 0x117   :  { %v205_v28 = vadd.f32 %v588_v23, %v204_v27 }
 0x118   :  { %v689_v29 = vpop.f32.mrf.mxu0 }
 0x119   :  { %v209_v31 = vmax.f32 %v205_v28, 0.0 }
 0x11b   :  { %v210_v32 = vpack.c.bf16 %v209_v31, %v208_v30 }
 0x11d   :  { %707 = vmatmul.mubr.bf16.vlgmr.msra.gmra.mxu1 %v210_v32 }
 0x11e   :  { %746 = vmatprep.mubr.msk.bf16.mxu1 %vm892_vm0, %v891_v0  ;;  %731 = vmatpush3.bf16.msra.mxu1 %v783_v36 }
 0x11f   :  { %732 = vmatprep.subr.bf16.mxu1 %v891_v0 }
 0x122   :  { %733 = vmatpush3.bf16.msra.mxu1 %v784_v37 }
 0x123   :  { %734 = vmatprep.subr.bf16.mxu1 %v891_v0 }
 0x126   :  { %735 = vmatpush3.bf16.msra.mxu1 %v785_v38 }
 0x127   :  { %736 = vmatprep.subr.bf16.mxu1 %v891_v0 }
 0x12a   :  { %737 = vmatpush3.bf16.msra.mxu1 %v786_v39 }
 0x12b   :  { %738 = vmatprep.subr.bf16.mxu1 %v891_v0 }
 0x12e   :  { %739 = vmatpush3.bf16.msra.mxu1 %v787_v40 }
 0x12f   :  { %740 = vmatprep.subr.bf16.mxu1 %v891_v0 }
 0x132   :  { %741 = vmatpush3.bf16.msra.mxu1 %v788_v51 }
 0x133   :  { %742 = vmatprep.subr.bf16.mxu1 %v891_v0 }
 0x136   :  { %743 = vmatpush3.bf16.msra.mxu1 %v789_v52 }
 0x137   :  { %744 = vmatprep.subr.bf16.mxu1 %v891_v0  ;;  %v616_v0 = vld [vmem:[%s1033_s8] ss:$0 sm:$0xff] }
 0x13a   :  { %745 = vmatpush3.bf16.msra.mxu1 %v790_v53 }
 0x1dd   :  { %v316_v42 = vpop.f32.mrf.mxu1 }
 0x1de   :  { %v317_v44 = vadd.f32 %v598_v41, %v316_v42 }
 0x1df   :  { %v708_v43 = vpop.f32.mrf.mxu1 }
 0x1e0   :  { %v323_v48 = vmax.f32 %v317_v44, 0.0 }
 0x1e1   :  { %v319_v45 = vpop.f32.mrf.mxu1 }
 0x1e2   :  { %v320_v46 = vadd.f32 %v598_v41, %v319_v45 }
 0x1e3   :  { %v709_v47 = vpop.f32.mrf.mxu1 }
 0x1e4   :  { %v324_v49 = vmax.f32 %v320_v46, 0.0 }
 0x1e6   :  { %v325_v50 = vpack.c.bf16 %v324_v49, %v323_v48 }
 0x1e8   :  { %727 = vmatmul.mubr.bf16.vlgmr.msra.gmra.mxu0 %v325_v50 }
 0x2a8   :  { %v431_v55 = vpop.f32.mrf.mxu0 }
 0x2a9   :  { %v432_v57 = vadd.f32 %v607_v54, %v431_v55 }
 0x2aa   :  { %v728_v56 = vpop.f32.mrf.mxu0 }
 0x2ab   :  { %v438_v61 = vmax.f32 %v432_v57, 0.0 }
 0x2ac   :  { %v434_v58 = vpop.f32.mrf.mxu0 }
 0x2ad   :  { %v435_v59 = vadd.f32 %v607_v54, %v434_v58 }
 0x2ae   :  { %v729_v60 = vpop.f32.mrf.mxu0 }
 0x2af   :  { %v439_v62 = vmax.f32 %v435_v59, 0.0 }
 0x2b1   :  { %v440_v63 = vpack.c.bf16 %v439_v62, %v438_v61 }
 0x2b3   :  { %747 = vmatmul.mubr.bf16.vlgmr.msra.gmra.mxu1 %v440_v63 }
 0x373   :  { %v546_v1 = vpop.f32.mrf.mxu1 }
 0x374   :  { %v547_v2 = vadd.f32 %v616_v0, %v546_v1 }
 0x375   :  { %v748_v3 = vpop.f32.mrf.mxu1 }
 0x376   :  { %553 = vmax.xlane.f32.xlu0 %v547_v2 }
 0x377   :  { %v549_v4 = vpop.f32.mrf.mxu1 }
 0x378   :  { %v550_v5 = vadd.f32 %v616_v0, %v549_v4 }
 0x379   :  { %v749_v6 = vpop.f32.mrf.mxu1 }
 0x37a   :  { %555 = vmax.xlane.f32.xlu0 %v550_v5 }
 0x3ff   :  { %v554_v7 = vpop.xlane.xlu0 %553 }
 0x400   :  { %v557_v8 = vsub.f32 %v547_v2, %v554_v7 }
 0x402   :  { %v559_v9 = vmul.f32 1.442695, %v557_v8 }
 0x403   :  { %v556_v10 = vpop.xlane.xlu0 %555 }
 0x404   :  { %791 = vpow2.f32 %v559_v9  ;;  %v558_v11 = vsub.f32 %v550_v5, %v556_v10 }
 0x406   :  { %v561_v12 = vmul.f32 1.442695, %v558_v11 }
 0x408   :  { %793 = vpow2.f32 %v561_v12 }
 0x411   :  { %v792_v13 = vpop.eup %791 }
 0x412   :  { %563 = vadd.xlane.f32.xlu1 %v792_v13 }
 0x415   :  { %v794_v14 = vpop.eup %793 }
 0x416   :  { %565 = vadd.xlane.f32.xlu1 %v794_v14 }
 0x49b   :  { %v564_v15 = vpop.xlane.xlu1 %563 }
 0x49c   :  { %795 = vrcp.f32 %v564_v15 }
 0x49f   :  { %v566_v16 = vpop.xlane.xlu1 %565 }
 0x4a0   :  { %797 = vrcp.f32 %v566_v16 }
 0x4a9   :  { %v796_v17 = vpop.eup %795 }
 0x4aa   :  { %v569_v19 = vmul.f32 %v796_v17, %v792_v13 }
 0x4ad   :  { %v798_v18 = vpop.eup %797 }
 0x4ae   :  { %v570_v20 = vmul.f32 %v798_v18, %v794_v14 }
 0x4b0   :  { %v632_v21 = vpack.c.bf16 %v570_v20, %v569_v19 }
 0x4b2   :  { %633 = vst [vmem:[%s1034_s9] sm:$0xff] %v632_v21  }
 0x4b3   :  { %585 = vsyncpa [#allocation3], 1 }
 0x4b4   :  { %586 = vsyncpa [#allocation5], 1 }
 0x4b5   :  { %587 = vsyncpa [#allocation8], 1 }

</bundles_post_ra>
